<compile_context>
chip_gen: v7x
topology: tpu7x:2x2x1
jax: 0.10.0
libtpu: 0.0.40
codegen_flags: <defaults>
</compile_context>

<pallas_src>
import jax
import jax.numpy as jnp
from jax.experimental import pallas as pl
from jax.experimental.pallas import tpu as pltpu

_LANE = 128
_TARGET_BLOCK_BYTES = 4 * 1024 * 1024   # ~4 MiB per block
_VMEM_LIMIT_BYTES = 32 * 1024 * 1024    # explicit scoped-VMEM request


def _cdiv(a: int, b: int) -> int:
    return -(-a // b)


def _sublane_multiple(dtype) -> int:
    itemsize = jnp.dtype(dtype).itemsize
    return {4: 8, 2: 16, 1: 32}.get(itemsize, 8)


def _make_rehu_kernel(a: float, b: float):
    a_half = a / 2.0
    clamp_max = -b  # = d/2 >= 0 (requires d > 0)

    def rehu_kernel(x_ref, o_ref):
        # Compute in f32 (avoids x*x overflow for low-precision inputs).
        x = x_ref[...].astype(jnp.float32)
        # clip(sign(x) * a/2 * x^2, 0, d/2) == min(a/2 * relu(x)^2, d/2)
        quad = jnp.minimum(a_half * jnp.square(jnp.maximum(x, 0.0)), clamp_max)
        o_ref[...] = jnp.maximum(quad, x + b).astype(o_ref.dtype)

    return rehu_kernel


def _choose_row_tile(rows: int, sub: int, itemsize: int) -> int:
    """Sublane-aligned rows-per-block (or full `rows` for tiny inputs)."""
    target_rows = max(sub, (_TARGET_BLOCK_BYTES // (_LANE * itemsize)) // sub * sub)
    if rows <= target_rows:
        # Small input: if possible split into >=2 aligned tiles so both
        # TensorCores get work on v7x under the "parallel" grid axis.
        if rows >= 2 * sub:
            return _cdiv(_cdiv(rows, 2), sub) * sub
        # Single block equal to the full array dims (allowed even if the row
        # count is not a sublane multiple).
        return rows
    # Large input: pick an even step count (2-TC balance on v7x), then size
    # the tile so the masked last block is nearly full.
    steps = _cdiv(rows, target_rows)
    if steps % 2:
        steps += 1
    per_step = _cdiv(rows, steps)
    return _cdiv(per_step, sub) * sub


def rehu(x: jnp.ndarray, d: float) -> jnp.ndarray:
    """Apply ReHU elementwise to x (any shape) using a Pallas TPU kernel."""
    assert d > 0, "ReHU requires d > 0 (as in the PyTorch module)."
    a = 1.0 / d
    b = -d / 2.0

    orig_shape = x.shape
    dtype = x.dtype
    itemsize = jnp.dtype(dtype).itemsize
    sub = _sublane_multiple(dtype)

    flat = x.reshape(-1)
    n = flat.shape[0]
    if n == 0:
        return x

    rows = _cdiv(n, _LANE)

    # Pad only when n is not a 128 multiple (rare). Ragged row counts are
    # handled by Pallas's masked partial last block — no extra HBM traffic.
    padded = rows * _LANE != n
    if padded:
        flat = jnp.pad(flat, (0, rows * _LANE - n))
    slab = flat.reshape(rows, _LANE)

    row_tile = _choose_row_tile(rows, sub, itemsize)
    grid_steps = _cdiv(rows, row_tile)

    kernel = _make_rehu_kernel(a, b)

    cost = pl.CostEstimate(
        flops=6 * n,
        transcendentals=0,
        bytes_accessed=2 * n * itemsize,
    )

    out_slab = pl.pallas_call(
        kernel,
        out_shape=jax.ShapeDtypeStruct((rows, _LANE), dtype),
        grid_spec=pltpu.PrefetchScalarGridSpec(
            num_scalar_prefetch=0,
            grid=(grid_steps,),
            in_specs=[pl.BlockSpec((row_tile, _LANE), lambda i: (i, 0))],
            out_specs=pl.BlockSpec((row_tile, _LANE), lambda i: (i, 0)),
        ),
        compiler_params=pltpu.CompilerParams(
            dimension_semantics=("parallel",),
            vmem_limit_bytes=_VMEM_LIMIT_BYTES,
        ),
        cost_estimate=cost,
        # Output reuses the input HBM buffer (donate x at the jit boundary in
        # real use for zero-copy; XLA inserts a copy otherwise, preserving
        # value semantics).
        input_output_aliases={0: 0},
    )(slab)

    if padded:
        return out_slab.reshape(-1)[:n].reshape(orig_shape)
    return out_slab.reshape(orig_shape)


def rehu_reference(x: jnp.ndarray, d: float) -> jnp.ndarray:
    """Plain-JAX reference matching the PyTorch forward exactly."""
    a = 1.0 / d
    b = -d / 2.0
    quad = jnp.clip(jnp.sign(x) * a / 2.0 * x * x, 0.0, -b)
    return jnp.maximum(quad, x + b)


if __name__ == "__main__":
    key = jax.random.PRNGKey(0)
    # Small NCHW-like input consistent with ReHU's use as an activation.
    x = jax.random.normal(key, (2, 4, 16, 16), dtype=jnp.float32) * 2.0
    d = 1.0  # ReHU(d) parameter; a = 1/d, b = -d/2

    ref = rehu_reference(x, d)
    out = jax.block_until_ready(rehu(x, d))

    assert out.shape == x.shape and out.dtype == x.dtype
    assert jnp.allclose(out, ref, atol=1e-6, rtol=1e-6), "mismatch vs reference"

    # Ragged / non-128-aligned shape (exercises the lane-padding path).
    x2 = jax.random.normal(jax.random.PRNGKey(1), (3, 5, 7, 11), dtype=jnp.float32)
    ref2 = rehu_reference(x2, 0.5)
    assert jnp.allclose(rehu(x2, 0.5), ref2, atol=1e-6, rtol=1e-6)

    # bf16 coverage.
    x3 = jax.random.normal(jax.random.PRNGKey(2), (2, 4, 16, 16), dtype=jnp.bfloat16)
    ref3 = rehu_reference(x3.astype(jnp.float32), 1.0)
    assert jnp.allclose(rehu(x3, 1.0).astype(jnp.float32), ref3, atol=1e-2, rtol=1e-2)

    print("KERNEL_OK")
</pallas_src>

<mosaic_0001>
module attributes {stable_mosaic.version = 11 : i64} {
  func.func @rehu_kernel(%arg0: i32, %arg1: memref<8x128xf32, #tpu.memory_space<vmem>>, %arg2: memref<8x128xf32, #tpu.memory_space<vmem>>) attributes {dimension_semantics = [#tpu.dimension_semantics<parallel>], iteration_bounds = array<i64: 2>, scalar_prefetch = 0 : i64, scratch_operands = 0 : i64, tpu.core_type = #tpu.core_type<tc>, window_params = [{transform_indices = @transform_0, window_bounds = array<i64: 8, 128>}, {transform_indices = @transform_1, window_bounds = array<i64: 8, 128>}]} {
    %c0 = arith.constant 0 : index
    %c0_0 = arith.constant 0 : index
    %0 = vector.load %arg1[%c0, %c0_0] : memref<8x128xf32, #tpu.memory_space<vmem>>, vector<8x128xf32>
    %cst = arith.constant 0.000000e+00 : f32
    %1 = vector.broadcast %cst : f32 to vector<8x128xf32>
    %2 = arith.maximumf %0, %1 : vector<8x128xf32>
    %3 = arith.mulf %2, %2 : vector<8x128xf32>
    %cst_1 = arith.constant 5.000000e-01 : f32
    %4 = vector.broadcast %cst_1 : f32 to vector<8x128xf32>
    %5 = arith.mulf %4, %3 : vector<8x128xf32>
    %cst_2 = arith.constant 5.000000e-01 : f32
    %6 = vector.broadcast %cst_2 : f32 to vector<8x128xf32>
    %7 = arith.minimumf %5, %6 : vector<8x128xf32>
    %cst_3 = arith.constant -5.000000e-01 : f32
    %8 = vector.broadcast %cst_3 : f32 to vector<8x128xf32>
    %9 = arith.addf %0, %8 : vector<8x128xf32>
    %10 = arith.maximumf %7, %9 : vector<8x128xf32>
    %c0_4 = arith.constant 0 : index
    %c0_5 = arith.constant 0 : index
    %11 = vector.load %arg2[%c0_4, %c0_5] : memref<8x128xf32, #tpu.memory_space<vmem>>, vector<8x128xf32>
    tpu.vector_store %arg2[%c0_4, %c0_5], %10 {strides = array<i32>} : memref<8x128xf32, #tpu.memory_space<vmem>>, vector<8x128xf32>,
    return
  }
  func.func @transform_0(%arg0: i32) -> (i32, i32) {
    %c0_i32 = arith.constant 0 : i32
    %c0_i32_0 = arith.constant 0 : i32
    return %arg0, %c0_i32 : i32, i32
  }
  func.func @transform_1(%arg0: i32) -> (i32, i32) {
    %c0_i32 = arith.constant 0 : i32
    %c0_i32_0 = arith.constant 0 : i32
    return %arg0, %c0_i32 : i32, i32
  }
}

</mosaic_0001>

<bundles_post_ra>
// kernel: tpu_custom_call.1
= control target key start
LH: loop header
LB: loop body
LE: loop exit
PB: predicated region body
PF: predicated region fallthrough
CT: control target
= control target key end

     0   :  { %6 = vsyncpa [#allocation3], 0  ;;  %s553_s0 = inlined_call_operand.hbm [shape: f32[16,128], index: 0, kind: input, shape index: {}, may-alias: {0,1}]   ;;  %s554_s1 = inlined_call_operand.hbm [shape: f32[16,128], index: 1, kind: output, shape index: {}, may-alias: {0,1}]  }
   0x1   :  { %8 = vsyncpa [#allocation3 + $0x1], 0 }
   0x2   :  { %9 = vsyncpa [#allocation4], 0 }
   0x3   :  { %11 = vsyncpa [#allocation4 + $0x1], 0  ;;  %s392_s6 = smov 0   ;;  %s394_s7 = smov 0  }
   0x4   :  { %s396_s8 = smov 0   ;;  %s398_s9 = smov 0  }
   0x5 LB: > { %s413_s10 = sadd.s32 4294967295, %s378_s9   ;;  %s224_s11 = sadd.s32 4294967294, %s378_s9   ;;  %s378_s9 = sphi %s398_s9, %s569_s9   ;;  %s374_s8 = sphi %s396_s8, %s568_s8   ;;  %s370_s7 = sphi %s394_s7, %s567_s7   ;;  %s366_s6 = sphi %s392_s6, %s566_s6  }
   0x6   : > { %s417_s12 = sadd.s32 1, %s378_s9   ;;  %s24_s13 = sadd.s32 1, %s374_s8 }
   0x7   : > { %s21_s14 = ssub.s32 %s378_s9, %s417_s12  ;;  %p31_p0 = scmp.ne.s32.totalorder %s374_s8, %s370_s7 }
   0x8   : > { %p22_p1 = scmp.eq.s32.totalorder %s21_s14, 0  ;;  %p32_p2 = scmp.eq.s32.totalorder %s378_s9, 0 }
   0x9   : > { %p37_p3 = scmp.ne.s32.totalorder %s370_s7, %s366_s6  ;;  %p38_p4 = scmp.eq.s32.totalorder %s413_s10, 0 }
   0xa   : > { %s429_s15 = scalar_select %p22_p1, %s374_s8, %s24_s13  }
   0xb   : > { %p431_p5 = por %p32_p2, %p31_p0  ;;  %p435_p6 = por %p38_p4, %p37_p3 }
   0xc   : > { %p61_p7 = scmp.eq.s32.totalorder %s413_s10, 1  ;;  %p67_p8 = scmp.eq.s32.totalorder %s224_s11, 1 }
   0xd   : > { %p248_p10 = scmp.lt.s32.totalorder %s378_s9, 2  ;;  %s87_s20 = sand.u32 1, %s374_s8  }
   0xe   : > { %p442_p11 = por %p61_p7, %p31_p0  ;;  %p446_p12 = por %p67_p8, %p37_p3 }
   0xf   : > { %s228_s21 = sshll.u32 %s378_s9, 7  ;;  %s227_s22 = sshll.u32 %s87_s20, 3 }
  0x10   : > { %s558_s18 = scalar_select %p442_p11, 1, 0 }
  0x11   : > { %s559_s19 = scalar_select %p446_p12, 1, 0 }
  0x12   : > { %s455_s25 = scalar_lea.hbm %s553_s0, %s228_s21  ;;  %s91_s26 = scalar_lea.vmem [#allocation2], %s227_s22 }
  0x13   : > { %s98_s27 = sshll.u32 %s91_s26, 4  ;;  %p459_p13 = pnand %p248_p10, %p431_p5  ;;  %s463_s27 = int_to_ptr.vmem [resolvable:$true] %s98_s27 }
  0x14   : > { %s88_s29 = scalar_lea.sflag [#allocation3], %s87_s20  ;;  %s282_s30 = scalar_lea.hbm %s455_s25, 128 }
  0x15   : > { %p283_p2 = scmp.ne.s32.totalorder %s455_s25, %s282_s30  ;;  %p284_p3 = pneg %p459_p13 }
  0x16   : > { %s287_s4 = scalar_lea.hbm %s553_s0, 256  ;;  %p288_p5 = scmp.lt.u32.totalorder %s455_s25, %s553_s0 }
  0x17   : > { %p285_p4 = pnand %p284_p3, %p283_p2  ;;  %p289_p8 = scmp.lt.u32.totalorder %s287_s4, %s282_s30 }
  0x18   : > { %p291_p9 = scmp.lt.u32.totalorder %s282_s30, %s455_s25 }
  0x19   : > { %p286_p7 = pneg %p285_p4  ;;  %p290_p10 = por %p289_p8, %p288_p5 }
  0x1b   : > { %p292_p0 = por %p291_p9, %p290_p10 }
  0x1d   : > { %p293_p1 = pnand %p292_p0, %p286_p7 }
  0x1f   : > { %296 = shalt.err (!%p293_p1)
}
  0x20   : > { %s297_s13 = scalar_lea.vmem %s463_s27, 128  ;;  %s380_s14 = smov [#allocation2]  }
  0x21   : > { %p298_p2 = scmp.ne.s32.totalorder %s463_s27, %s297_s13  ;;  %s302_s16 = sshll.u32 %s380_s14, 4  ;;  %s303_s16 = int_to_ptr.vmem [resolvable:$false] %s302_s16 }
  0x22   : > { %s304_s20 = scalar_lea.vmem %s303_s16, 256  ;;  %p305_p11 = scmp.lt.s32.totalorder %s463_s27, %s303_s16 }
  0x23   : > { %p300_p4 = pnand %p298_p2, %p284_p3  ;;  %p306_p5 = scmp.lt.s32.totalorder %s304_s20, %s297_s13 }
  0x25   : > { %p301_p12 = pneg %p300_p4  ;;  %p307_p8 = por %p306_p5, %p305_p11 }
  0x27   : > { %p308_p9 = pnand %p307_p8, %p301_p12 }
  0x29   : > { %311 = shalt.err (!%p308_p9)
}
  0x2a   : > { %243 = dma.hbm_to_vmem [thread:$0]  (!%p459_p13), %s455_s25, 128, %s463_s27, %s88_s29  }
  0x2b   : > { %p561_p0 = scmp.lt.s32.totalorder %s378_s9, 3  ;;  %p562_p1 = scmp.ge.s32.totalorder %s378_s9, 1 }
  0x2d   : > { %p104_p3 = pnand %p562_p1, %p561_p0 }
  0x2e   : > { %s497_s21 = sand.u32 (!%p104_p3), 1, %s370_s7  }
  0x2f   : > { %107 = sbr.rel (%p104_p3) target bundleno = 81 (0x51), region = 24  ;;  %s230_s22 = sshll.u32 (!%p104_p3), %s497_s21, 3 }
  0x30   : > { %s110_s23 = scalar_lea.sflag (!%p104_p3), [#allocation3], %s497_s21  ;;  %s113_s24 = scalar_lea.vmem (!%p104_p3), [#allocation2], %s230_s22 }
  0x36   : > { %357 = dma.done.wait (%p435_p6), %s110_s23, 128  }
  0x37   : > { %359 = vsyncadd (%p435_p6), %s110_s23, 4294967168  ;;  %v132_v0 = vld [vmem:[%s113_s24] sm:$0xff]  ;;  %s131_s25 = scalar_lea.vmem [#allocation5], %s230_s22  ;;  %s233_s27 = sshll.u32 %s413_s10, 7 }
  0x38   : > { %v133_v1 = vmax.f32 %v132_v0, 0.0  ;;  %v137_v4 = vadd.f32 -0.5, %v132_v0  ;;  %s154_s26 = sshll.u32 %s131_s25, 4  ;;  %s511_s17 = scalar_lea.hbm %s554_s1, %s233_s27  ;;  %s506_s26 = int_to_ptr.vmem [resolvable:$true] %s154_s26 }
  0x39   : > { %s141_s30 = scalar_lea.sflag [#allocation4], %s497_s21  ;;  %s312_s2 = scalar_lea.vmem %s506_s26, 128 }
  0x3a   : > { %v134_v2 = vmul.f32 %v133_v1, %v133_v1  ;;  %p313_p6 = scmp.ne.s32.totalorder %s506_s26, %s312_s2  ;;  %p563_p11 = scmp.ne.s32.totalorder %s558_s18, 0 }
  0x3b   : > { %s381_s10 = smov [#allocation5]  }
  0x3c   : > { %v135_v3 = vmul.f32 0.5, %v134_v2  ;;  %p314_p12 = pnand %p313_p6, %p563_p11  ;;  %s316_s3 = sshll.u32 %s381_s10, 4  ;;  %s317_s3 = int_to_ptr.vmem [resolvable:$false] %s316_s3 }
  0x3d   : > { %s318_s4 = scalar_lea.vmem %s317_s3, 256  ;;  %p319_p7 = scmp.lt.s32.totalorder %s506_s26, %s317_s3 }
  0x3e   : > { %v136_v5 = vmin.f32 %v135_v3, 0.5  ;;  %p315_p13 = pneg %p314_p12  ;;  %p320_p10 = scmp.lt.s32.totalorder %s318_s4, %s312_s2 }
  0x40   : > { %v138_v6 = vmax.f32 %v136_v5, %v137_v4  ;;  %p321_p2 = por %p320_p10, %p319_p7 }
  0x42   : > { %139 = vst [vmem:[%s131_s25] sm:$0xff] %v138_v6  ;;  %p322_p4 = pnand %p321_p2, %p315_p13 }
  0x44   : > { %325 = shalt.err (!%p322_p4)
}
  0x45   : > { %s326_s5 = scalar_lea.hbm %s511_s17, 128  ;;  %s330_s14 = scalar_lea.hbm %s554_s1, 256 }
  0x46   : > { %p327_p5 = scmp.ne.s32.totalorder %s511_s17, %s326_s5  ;;  %p331_p0 = scmp.lt.u32.totalorder %s511_s17, %s554_s1 }
  0x47   : > { %p332_p1 = scmp.lt.u32.totalorder %s330_s14, %s326_s5  ;;  %p334_p6 = scmp.lt.u32.totalorder %s326_s5, %s511_s17 }
  0x48   : > { %p328_p8 = pnand %p327_p5, %p563_p11 }
  0x49   : > { %p333_p3 = por %p332_p1, %p331_p0 }
  0x4a   : > { %p329_p9 = pneg %p328_p8 }
  0x4b   : > { %p335_p12 = por %p334_p6, %p333_p3 }
  0x4d   : > { %p336_p13 = pnand %p335_p12, %p329_p9 }
  0x4f   : > { %339 = shalt.err (!%p336_p13)
}
  0x50   : > { %238 = dma.vmem_to_hbm [thread:$0]  (%p563_p11), %s506_s26, 128, %s511_s17, %s141_s30  }
  0x51 PF: > { %s166_s21 = sand.u32 1, %s366_s6   ;;  %p564_p7 = scmp.ne.s32.totalorder %s559_s19, 0 }
  0x52   : > { %p565_p10 = scmp.ge.s32.totalorder %s378_s9, 2  ;;  %s167_s22 = scalar_lea.sflag [#allocation4], %s166_s21 }
  0x54   : > { %p245_p2 = pnand %p565_p10, %p564_p7 }
  0x56   : > { %361 = dma.done.wait (!%p245_p2), %s167_s22, 128  }
  0x57   : > { %363 = vsyncadd (!%p245_p2), %s167_s22, 4294967168  ;;  %p14_p4 = scmp.ge.s32.totalorder %s417_s12, 4   ;;  %s566_s6 = smov %s370_s7 }
  0x58   : > { %s567_s7 = smov %s374_s8  ;;  %s568_s8 = smov %s429_s15 }
  0x59   : > { %s569_s9 = smov %s417_s12  ;;  %16 = sbr.rel (!%p14_p4) target bundleno = 5 (0x5), region = 69 }
  0x60   :  { %172 = vsyncpa [#allocation3], 1 }
  0x61   :  { %174 = vsyncpa [#allocation3 + $0x1], 1 }
  0x62   :  { %175 = vsyncpa [#allocation4], 1 }
  0x63   :  { %177 = vsyncpa [#allocation4 + $0x1], 1 }

</bundles_post_ra>
